<compile_context>
chip_gen: v6e
topology: v6e:2x2x1
jax: 0.10.0
libtpu: 0.0.40
codegen_flags: <defaults>
</compile_context>

<pallas_src>
import functools

import jax
import jax.numpy as jnp
from jax.experimental import pallas as pl
from jax.experimental.pallas import tpu as pltpu


def _round_up(n, m):
    return (n + m - 1) // m * m


def qnet_kernel(x_ref, w1_ref, b1_ref, w2_ref, b2_ref, w3_ref, b3_ref, o_ref):
    """Fused fc1 -> relu -> fc2 -> relu -> fc3 on one (TM, 12) batch tile.

    fc1 in f32 (K=12, free); fc2/fc3 feed the MXU in bf16 with f32 accumulation;
    bias add + ReLU in f32; output stored as f32 (TM, 16).
    """
    x = x_ref[...]                                                    # (TM, 12) f32
    # fc1 + ReLU (f32)
    h1 = jnp.dot(x, w1_ref[...], preferred_element_type=jnp.float32) + b1_ref[...]
    h1 = jnp.maximum(h1, 0.0).astype(jnp.bfloat16)                    # (TM, H) bf16
    # fc2 + ReLU (bf16 MXU feed, f32 accumulate)
    h2 = jnp.dot(h1, w2_ref[...], preferred_element_type=jnp.float32) + b2_ref[...]
    h2 = jnp.maximum(h2, 0.0).astype(jnp.bfloat16)                    # (TM, H) bf16
    # fc3 (no activation), narrow f32 output
    out = jnp.dot(h2, w3_ref[...], preferred_element_type=jnp.float32) + b3_ref[...]
    o_ref[...] = out                                                  # (TM, 16) f32


def prepare_qnet_params(w1, b1, w2, b2, w3, b3):
    """One-time parameter prep (hoisted out of the per-call path).

    Weights are stored as (in_features, out_features) so y = x @ W + b
    (== PyTorch x @ W.T + b).  fc1 stays f32; fc2/fc3 weights are bf16.
    """
    return (
        w1.astype(jnp.float32),                    # (12, 128)  f32
        b1.reshape(1, -1).astype(jnp.float32),     # (1, 128)   f32
        w2.astype(jnp.bfloat16),                   # (128, 128) bf16
        b2.reshape(1, -1).astype(jnp.float32),     # (1, 128)   f32
        w3.astype(jnp.bfloat16),                   # (128, 16)  bf16
        b3.reshape(1, -1).astype(jnp.float32),     # (1, 16)    f32
    )


@functools.partial(jax.jit, static_argnames=("tm",))
def qnet_forward(x, w1, b1, w2, b2, w3, b3, *, tm=128):
    batch, in_features = x.shape
    hidden = w1.shape[1]
    out_features = w3.shape[1]

    # Clamp the tile for small batches (keep it a multiple of 8), pad batch to a
    # multiple of the tile.  No lane padding anywhere.
    tm_eff = min(tm, _round_up(batch, 8))
    batch_p = _round_up(batch, tm_eff)
    x_p = x.astype(jnp.float32)
    if batch_p != batch:
        x_p = jnp.pad(x_p, ((0, batch_p - batch), (0, 0)))

    grid = (batch_p // tm_eff,)

    flops = 2 * batch_p * (in_features * hidden + hidden * hidden + hidden * out_features)
    bytes_accessed = (
        batch_p * in_features * 4                       # x read
        + w1.size * 4 + w2.size * 2 + w3.size * 2       # weights (read once)
        + (b1.size + b2.size + b3.size) * 4             # biases
        + batch_p * out_features * 4                    # output write
    )

    const = lambda shape: pl.BlockSpec(shape, lambda i: (0, 0))

    out_padded = pl.pallas_call(
        qnet_kernel,
        out_shape=jax.ShapeDtypeStruct((batch_p, out_features), jnp.float32),
        grid=grid,
        in_specs=[
            pl.BlockSpec((tm_eff, in_features), lambda i: (i, 0)),  # x: batch-tiled, unpadded
            const((in_features, hidden)),                            # w1: resident
            const((1, hidden)),                                      # b1
            const((hidden, hidden)),                                 # w2
            const((1, hidden)),                                      # b2
            const((hidden, out_features)),                           # w3 (unpadded)
            const((1, out_features)),                                # b3 (unpadded)
        ],
        out_specs=pl.BlockSpec((tm_eff, out_features), lambda i: (i, 0)),
        compiler_params=pltpu.CompilerParams(
            dimension_semantics=("parallel",)),
        cost_estimate=pl.CostEstimate(
            flops=flops, transcendentals=0, bytes_accessed=bytes_accessed),
    )(x_p, w1, b1, w2, b2, w3, b3)

    return out_padded[:batch]


def init_linear(key, in_features, out_features):
    """PyTorch-style nn.Linear init: U(-1/sqrt(fan_in), 1/sqrt(fan_in)).
    Weight stored transposed as (in_features, out_features)."""
    kw, kb = jax.random.split(key)
    bound = 1.0 / (in_features ** 0.5)
    w = jax.random.uniform(kw, (in_features, out_features), jnp.float32, -bound, bound)
    b = jax.random.uniform(kb, (out_features,), jnp.float32, -bound, bound)
    return w, b


def reference_forward(x, w1, b1, w2, b2, w3, b3):
    h1 = jnp.maximum(x @ w1 + b1, 0.0)
    h2 = jnp.maximum(h1 @ w2 + b2, 0.0)
    return h2 @ w3 + b3


if __name__ == "__main__":
    # Module hyper-params (consistent with Qnet.__init__)
    num_lift = 2
    num_robot = 2
    num_actions_per_agent = 4
    num_agents = num_lift + num_robot
    input_size = num_lift * 2 + num_robot * 2 + num_actions_per_agent   # 12
    hidden = 128
    output_size = num_agents * num_actions_per_agent                    # 16
    batch = 512      # tm=128 -> 4 grid steps (even split on v7x's 2 TCs)

    key = jax.random.PRNGKey(0)
    kx, k1, k2, k3 = jax.random.split(key, 4)

    x = jax.random.normal(kx, (batch, input_size), jnp.float32)
    w1, b1 = init_linear(k1, input_size, hidden)
    w2, b2 = init_linear(k2, hidden, hidden)
    w3, b3 = init_linear(k3, hidden, output_size)

    # One-time param prep (bf16 casts, bias layout) hoisted out of the forward.
    params = prepare_qnet_params(w1, b1, w2, b2, w3, b3)

    out = qnet_forward(x, *params, tm=128)
    out = jax.block_until_ready(out)

    ref = reference_forward(x, w1, b1.reshape(1, -1), w2, b2.reshape(1, -1),
                            w3, b3.reshape(1, -1))
    assert out.shape == (batch, output_size)
    # fc2/fc3 use bf16 MXU feeds with f32 accumulation -> loosened tolerance.
    max_err = float(jnp.max(jnp.abs(out - ref)))
    assert max_err < 5e-2, f"mismatch vs reference (max abs err {max_err})"
    assert jnp.allclose(out, ref, atol=5e-2, rtol=5e-2), "mismatch vs reference"

    print("KERNEL_OK")
</pallas_src>

<mosaic_0001>
module attributes {stable_mosaic.version = 11 : i64} {
  func.func @qnet_kernel(%arg0: i32, %arg1: memref<128x12xf32, #tpu.memory_space<vmem>>, %arg2: memref<12x128xf32, #tpu.memory_space<vmem>>, %arg3: memref<1x128xf32, #tpu.memory_space<vmem>>, %arg4: memref<128x128xbf16, #tpu.memory_space<vmem>>, %arg5: memref<1x128xf32, #tpu.memory_space<vmem>>, %arg6: memref<128x16xbf16, #tpu.memory_space<vmem>>, %arg7: memref<1x16xf32, #tpu.memory_space<vmem>>, %arg8: memref<128x16xf32, #tpu.memory_space<vmem>>) attributes {dimension_semantics = [#tpu.dimension_semantics<parallel>], iteration_bounds = array<i64: 4>, scalar_prefetch = 0 : i64, scratch_operands = 0 : i64, tpu.core_type = #tpu.core_type<tc>, window_params = [{transform_indices = @transform_0, window_bounds = array<i64: 128, 12>}, {pipeline_mode = #tpu.pipeline_mode<synchronous>, transform_indices = @transform_1, window_bounds = array<i64: 12, 128>}, {pipeline_mode = #tpu.pipeline_mode<synchronous>, transform_indices = @transform_2, window_bounds = array<i64: 1, 128>}, {pipeline_mode = #tpu.pipeline_mode<synchronous>, transform_indices = @transform_3, window_bounds = array<i64: 128, 128>}, {pipeline_mode = #tpu.pipeline_mode<synchronous>, transform_indices = @transform_4, window_bounds = array<i64: 1, 128>}, {pipeline_mode = #tpu.pipeline_mode<synchronous>, transform_indices = @transform_5, window_bounds = array<i64: 128, 16>}, {pipeline_mode = #tpu.pipeline_mode<synchronous>, transform_indices = @transform_6, window_bounds = array<i64: 1, 16>}, {transform_indices = @transform_7, window_bounds = array<i64: 128, 16>}]} {
    %c0 = arith.constant 0 : index
    %c0_0 = arith.constant 0 : index
    %0 = vector.load %arg1[%c0, %c0_0] : memref<128x12xf32, #tpu.memory_space<vmem>>, vector<128x12xf32>
    %c0_1 = arith.constant 0 : index
    %c0_2 = arith.constant 0 : index
    %1 = vector.load %arg2[%c0_1, %c0_2] : memref<12x128xf32, #tpu.memory_space<vmem>>, vector<12x128xf32>
    %cst = arith.constant dense<0.000000e+00> : vector<128x128xf32>
    %2 = tpu.matmul %0, %1, %cst {dimension_numbers = #tpu.dot_dimension_numbers<[1], [0], [0], [1], [0, 0, 1, 1], [], []>} : vector<128x12xf32>, vector<12x128xf32>, vector<128x128xf32> -> vector<128x128xf32>
    %c0_3 = arith.constant 0 : index
    %c0_4 = arith.constant 0 : index
    %3 = vector.load %arg3[%c0_3, %c0_4] : memref<1x128xf32, #tpu.memory_space<vmem>>, vector<1x128xf32>
    %4 = vector.broadcast %3 : vector<1x128xf32> to vector<128x128xf32>
    %5 = arith.addf %2, %4 : vector<128x128xf32>
    %cst_5 = arith.constant 0.000000e+00 : f32
    %6 = vector.broadcast %cst_5 : f32 to vector<128x128xf32>
    %7 = arith.maximumf %5, %6 : vector<128x128xf32>
    %8 = arith.truncf %7 : vector<128x128xf32> to vector<128x128xbf16>
    %c0_6 = arith.constant 0 : index
    %c0_7 = arith.constant 0 : index
    %9 = vector.load %arg4[%c0_6, %c0_7] : memref<128x128xbf16, #tpu.memory_space<vmem>>, vector<128x128xbf16>
    %cst_8 = arith.constant dense<0.000000e+00> : vector<128x128xf32>
    %10 = tpu.matmul %8, %9, %cst_8 {dimension_numbers = #tpu.dot_dimension_numbers<[1], [0], [0], [1], [0, 0, 1, 1], [], []>} : vector<128x128xbf16>, vector<128x128xbf16>, vector<128x128xf32> -> vector<128x128xf32>
    %c0_9 = arith.constant 0 : index
    %c0_10 = arith.constant 0 : index
    %11 = vector.load %arg5[%c0_9, %c0_10] : memref<1x128xf32, #tpu.memory_space<vmem>>, vector<1x128xf32>
    %12 = vector.broadcast %11 : vector<1x128xf32> to vector<128x128xf32>
    %13 = arith.addf %10, %12 : vector<128x128xf32>
    %cst_11 = arith.constant 0.000000e+00 : f32
    %14 = vector.broadcast %cst_11 : f32 to vector<128x128xf32>
    %15 = arith.maximumf %13, %14 : vector<128x128xf32>
    %16 = arith.truncf %15 : vector<128x128xf32> to vector<128x128xbf16>
    %c0_12 = arith.constant 0 : index
    %c0_13 = arith.constant 0 : index
    %17 = vector.load %arg6[%c0_12, %c0_13] : memref<128x16xbf16, #tpu.memory_space<vmem>>, vector<128x16xbf16>
    %cst_14 = arith.constant dense<0.000000e+00> : vector<128x16xf32>
    %18 = tpu.matmul %16, %17, %cst_14 {dimension_numbers = #tpu.dot_dimension_numbers<[1], [0], [0], [1], [0, 0, 1, 1], [], []>} : vector<128x128xbf16>, vector<128x16xbf16>, vector<128x16xf32> -> vector<128x16xf32>
    %c0_15 = arith.constant 0 : index
    %c0_16 = arith.constant 0 : index
    %19 = vector.load %arg7[%c0_15, %c0_16] : memref<1x16xf32, #tpu.memory_space<vmem>>, vector<1x16xf32>
    %20 = vector.broadcast %19 : vector<1x16xf32> to vector<128x16xf32>
    %21 = arith.addf %18, %20 : vector<128x16xf32>
    %c0_17 = arith.constant 0 : index
    %c0_18 = arith.constant 0 : index
    %22 = vector.load %arg8[%c0_17, %c0_18] : memref<128x16xf32, #tpu.memory_space<vmem>>, vector<128x16xf32>
    tpu.vector_store %arg8[%c0_17, %c0_18], %21 {strides = array<i32>} : memref<128x16xf32, #tpu.memory_space<vmem>>, vector<128x16xf32>,
    return
  }
  func.func @transform_0(%arg0: i32) -> (i32, i32) {
    %c0_i32 = arith.constant 0 : i32
    %c0_i32_0 = arith.constant 0 : i32
    return %arg0, %c0_i32 : i32, i32
  }
  func.func @transform_1(%arg0: i32) -> (i32, i32) {
    %c0_i32 = arith.constant 0 : i32
    %c0_i32_0 = arith.constant 0 : i32
    %c0_i32_1 = arith.constant 0 : i32
    return %c0_i32, %c0_i32_0 : i32, i32
  }
  func.func @transform_2(%arg0: i32) -> (i32, i32) {
    %c0_i32 = arith.constant 0 : i32
    %c0_i32_0 = arith.constant 0 : i32
    %c0_i32_1 = arith.constant 0 : i32
    return %c0_i32, %c0_i32_0 : i32, i32
  }
  func.func @transform_3(%arg0: i32) -> (i32, i32) {
    %c0_i32 = arith.constant 0 : i32
    %c0_i32_0 = arith.constant 0 : i32
    %c0_i32_1 = arith.constant 0 : i32
    return %c0_i32, %c0_i32_0 : i32, i32
  }
  func.func @transform_4(%arg0: i32) -> (i32, i32) {
    %c0_i32 = arith.constant 0 : i32
    %c0_i32_0 = arith.constant 0 : i32
    %c0_i32_1 = arith.constant 0 : i32
    return %c0_i32, %c0_i32_0 : i32, i32
  }
  func.func @transform_5(%arg0: i32) -> (i32, i32) {
    %c0_i32 = arith.constant 0 : i32
    %c0_i32_0 = arith.constant 0 : i32
    %c0_i32_1 = arith.constant 0 : i32
    return %c0_i32, %c0_i32_0 : i32, i32
  }
  func.func @transform_6(%arg0: i32) -> (i32, i32) {
    %c0_i32 = arith.constant 0 : i32
    %c0_i32_0 = arith.constant 0 : i32
    %c0_i32_1 = arith.constant 0 : i32
    return %c0_i32, %c0_i32_0 : i32, i32
  }
  func.func @transform_7(%arg0: i32) -> (i32, i32) {
    %c0_i32 = arith.constant 0 : i32
    %c0_i32_0 = arith.constant 0 : i32
    return %arg0, %c0_i32 : i32, i32
  }
}

</mosaic_0001>

<bundles_post_ra>
// kernel: qnet_forward.1
= control target key start
LH: loop header
LB: loop body
LE: loop exit
PB: predicated region body
PF: predicated region fallthrough
CT: control target
= control target key end

     0   :  { %s1224_s24 = smov 0   ;;  %s1379_s0 = inlined_call_operand.vmem [shape: f32[512,12], index: 0, kind: input, shape index: {}]   ;;  %s1380_s1 = inlined_call_operand.vmem [shape: f32[12,128], index: 1, kind: input, shape index: {}]   ;;  %s1381_s2 = inlined_call_operand.vmem [shape: f32[1,128], index: 2, kind: input, shape index: {}]   ;;  %s1382_s3 = inlined_call_operand.vmem [shape: bf16[128,128], index: 3, kind: input, shape index: {}]   ;;  %s1383_s4 = inlined_call_operand.vmem [shape: f32[1,128], index: 4, kind: input, shape index: {}]   ;;  %s1384_s5 = inlined_call_operand.vmem [shape: bf16[128,16], index: 5, kind: input, shape index: {}]   ;;  %s1385_s6 = inlined_call_operand.vmem [shape: f32[1,16], index: 6, kind: input, shape index: {}]   ;;  %s1386_s7 = inlined_call_operand.vmem [shape: f32[512,16], index: 7, kind: output, shape index: {}]  }
   0x1 LB: > { %s963_s25 = sadd.s32 4294967295, %s1182_s24   ;;  %p967_p0 = scmp.ge.s32.totalorder %s1182_s24, 1  ;;  %s1182_s24 = sphi %s1224_s24, %s17_s24  }
   0x2   : > { %p238_p1 = scmp.lt.s32.totalorder %s1182_s24, 5 }
   0x4   : > { %p239_p2 = pnand %p967_p0, %p238_p1 }
   0x5   : > { %s968_s30 = sshll.u32 (!%p239_p2), %s963_s25, 4 }
   0x6   : > { %242 = sbr.rel (%p239_p2) target bundleno = 653 (0x28d), region = 48  ;;  %p271_p3 = scmp.lt.s32.totalorder (!%p239_p2), %s968_s30, 63 }
   0xb   : > { %v300_v0 = vld [vmem:[%s1380_s1 + $0x8] sm:$0xf]  ;;  %vm357_vm0 = vcmask 1043456   ;;  %v299_v1 = vld [vmem:[%s1380_s1] sm:$0xff]  ;;  %v1160_v2 = vld [vmem:[%s1382_s3 + $0x38] sm:$0xff]   ;;  %s1388_s30 = smov (!%p271_p3, %s968_s30), 63 }
   0xc   : > { %1060 = vmatprep.subr.msk.mxu0 %vm357_vm0, %v300_v0  ;;  %v1161_v3 = vld [vmem:[%s1382_s3 + $0x30] sm:$0xff]   ;;  %1088 = vmatprep.subr.bf16.mxu1 %v1160_v2  ;;  %vm308_vm1 = vcmask 97280   ;;  %s969_s12 = sshll.u32 %s1388_s30, 3  ;;  %v1162_v4 = vld [vmem:[%s1382_s3 + $0x28] sm:$0xff]   ;;  %v1163_v8 = vld [vmem:[%s1382_s3 + $0x20] sm:$0xff]   ;;  %vm890_vm2 = vcmask 130048  }
   0xd   : > { %1061 = vmatpush3.msk.msra.mxu0 %vm357_vm0, %v300_v0  ;;  %1089 = vmatpush3.bf16.msra.mxu1 %v1160_v2  ;;  %s1255_s17 = scalar_lea.vmem %s1379_s0, %s969_s12  ;;  %v1164_v11 = vld [vmem:[%s1382_s3 + $0x18] sm:$0xff]   ;;  %v1165_v23 = vld [vmem:[%s1382_s3 + $0x10] sm:$0xff]   ;;  %v1166_v24 = vld [vmem:[%s1382_s3 + $0x8] sm:$0xff]   ;;  %s1342_s11 = scalar_lea.vmem %s1386_s7, %s969_s12 }
   0xe   : > { %1062 = vmatprep.subr.mxu0 %v299_v1  ;;  %1090 = vmatprep.subr.bf16.mxu1 %v1161_v3  ;;  %v283_v5 = vld [vmem:[%s1255_s17] sm:$0xff]  ;;  %v284_v6 = vld [vmem:[%s1255_s17 + $0x8] sm:$0xff]  ;;  %v285_v7 = vld [vmem:[%s1255_s17 + $0x10] sm:$0xff] }
   0xf   : > { %1063 = vmatpush3.msra.mxu0 %v299_v1  ;;  %1064 = vmatprep.mubr.msk.f32.mxu0 %vm308_vm1, %v283_v5  ;;  %v286_v9 = vld [vmem:[%s1255_s17 + $0x18] sm:$0xff]  ;;  %v287_v10 = vld [vmem:[%s1255_s17 + $0x20] sm:$0xff]  ;;  %v288_v12 = vld [vmem:[%s1255_s17 + $0x28] sm:$0xff] }
  0x10   : > { %1065 = vmatmul.mubr.msk.f32.vlgmr.msra.gmra.mxu0 %vm308_vm1, %v284_v6  ;;  %v289_v13 = vld [vmem:[%s1255_s17 + $0x30] sm:$0xff]  ;;  %v290_v14 = vld [vmem:[%s1255_s17 + $0x38] sm:$0xff]  ;;  %v291_v15 = vld [vmem:[%s1255_s17 + $0x40] sm:$0xff] }
  0x11   : > { %1091 = vmatpush3.bf16.msra.mxu1 %v1161_v3  ;;  %1067 = vmatprep.mubr.msk.f32.mxu0 %vm308_vm1, %v285_v7  ;;  %v292_v16 = vld [vmem:[%s1255_s17 + $0x48] sm:$0xff]  ;;  %v293_v17 = vld [vmem:[%s1255_s17 + $0x50] sm:$0xff]  ;;  %v294_v18 = vld [vmem:[%s1255_s17 + $0x58] sm:$0xff] }
  0x12   : > { %1092 = vmatprep.subr.bf16.mxu1 %v1162_v4  ;;  %v295_v19 = vld [vmem:[%s1255_s17 + $0x60] sm:$0xff]  ;;  %v296_v20 = vld [vmem:[%s1255_s17 + $0x68] sm:$0xff]  ;;  %v297_v21 = vld [vmem:[%s1255_s17 + $0x70] sm:$0xff] }
  0x13   : > { %v298_v22 = vld [vmem:[%s1255_s17 + $0x78] sm:$0xff]  ;;  %v1167_v25 = vld [vmem:[%s1382_s3] sm:$0xff]   ;;  %v1169_v27 = vld [vmem:[%s1384_s5 + $0x30] sm:$0xff]  }
  0x14   : > { %1068 = vmatmul.mubr.msk.f32.gmra.mxu0 %vm308_vm1, %v286_v9  ;;  %v1168_v26 = vld [vmem:[%s1384_s5 + $0x38] sm:$0xff]   ;;  %v1170_v28 = vld [vmem:[%s1384_s5 + $0x28] sm:$0xff]   ;;  %v1171_v29 = vld [vmem:[%s1384_s5 + $0x20] sm:$0xff]  }
  0x15   : > { %1093 = vmatpush3.bf16.msra.mxu1 %v1162_v4  ;;  %1070 = vmatprep.mubr.msk.f32.mxu0 %vm308_vm1, %v287_v10  ;;  %v1172_v30 = vld [vmem:[%s1384_s5 + $0x18] sm:$0xff]   ;;  %v972_v31 = vld [vmem:[%s1381_s2] ss:$0 sm:$0xff] }
  0x16   : > { %1094 = vmatprep.subr.bf16.mxu1 %v1163_v8  ;;  %1120 = vmatprep.subr.bf16.mxu0 %v1168_v26 }
  0x17   : > { %1121 = vmatpush3.bf16.msra.mxu0 %v1168_v26  ;;  %v1175_v26 = vld [vmem:[%s1384_s5] sm:$0xff]  }
  0x18   : > { %1071 = vmatmul.mubr.msk.f32.gmra.mxu0 %vm308_vm1, %v288_v12  ;;  %1122 = vmatprep.subr.bf16.mxu0 %v1169_v27 }
  0x19   : > { %1095 = vmatpush3.bf16.msra.mxu1 %v1163_v8  ;;  %1073 = vmatprep.mubr.msk.f32.mxu0 %vm308_vm1, %v289_v13 }
  0x1a   : > { %1096 = vmatprep.subr.bf16.mxu1 %v1164_v11 }
  0x1b   : > { %1123 = vmatpush3.bf16.msra.mxu0 %v1169_v27 }
  0x1c   : > { %1074 = vmatmul.mubr.msk.f32.gmra.mxu0 %vm308_vm1, %v290_v14  ;;  %1124 = vmatprep.subr.bf16.mxu0 %v1170_v28 }
  0x1d   : > { %1097 = vmatpush3.bf16.msra.mxu1 %v1164_v11  ;;  %1076 = vmatprep.mubr.msk.f32.mxu0 %vm308_vm1, %v291_v15 }
  0x1e   : > { %1098 = vmatprep.subr.bf16.mxu1 %v1165_v23 }
  0x1f   : > { %1125 = vmatpush3.bf16.msra.mxu0 %v1170_v28 }
  0x20   : > { %1077 = vmatmul.mubr.msk.f32.gmra.mxu0 %vm308_vm1, %v292_v16  ;;  %1126 = vmatprep.subr.bf16.mxu0 %v1171_v29 }
  0x21   : > { %1079 = vmatprep.mubr.msk.f32.mxu0 %vm308_vm1, %v293_v17  ;;  %1099 = vmatpush3.bf16.msra.mxu1 %v1165_v23 }
  0x22   : > { %1100 = vmatprep.subr.bf16.mxu1 %v1166_v24 }
  0x23   : > { %1127 = vmatpush3.bf16.msra.mxu0 %v1171_v29  ;;  %v990_v29 = vld [vmem:[%s1383_s4] ss:$0 sm:$0xff] }
  0x24   : > { %1080 = vmatmul.mubr.msk.f32.gmra.mxu0 %vm308_vm1, %v294_v18  ;;  %1128 = vmatprep.subr.bf16.mxu0 %v1172_v30 }
  0x25   : > { %1082 = vmatprep.mubr.msk.f32.mxu0 %vm308_vm1, %v295_v19  ;;  %1101 = vmatpush3.bf16.msra.mxu1 %v1166_v24  ;;  %v1173_v24 = vld [vmem:[%s1384_s5 + $0x10] sm:$0xff]  }
  0x26   : > { %1102 = vmatprep.subr.bf16.mxu1 %v1167_v25 }
  0x27   : > { %1129 = vmatpush3.bf16.msra.mxu0 %v1172_v30 }
  0x28   : > { %1083 = vmatmul.mubr.msk.f32.gmra.mxu0 %vm308_vm1, %v296_v20  ;;  %1130 = vmatprep.subr.bf16.mxu0 %v1173_v24 }
  0x29   : > { %1085 = vmatprep.mubr.msk.f32.mxu0 %vm308_vm1, %v297_v21  ;;  %1103 = vmatpush3.bf16.msra.mxu1 %v1167_v25  ;;  %v1174_v25 = vld [vmem:[%s1384_s5 + $0x8] sm:$0xff]  }
  0x2b   : > { %1131 = vmatpush3.bf16.msra.mxu0 %v1173_v24 }
  0x2c   : > { %1086 = vmatmul.mubr.msk.f32.gmra.mxu0 %vm308_vm1, %v298_v22  ;;  %1132 = vmatprep.subr.bf16.mxu0 %v1174_v25 }
  0x2f   : > { %1133 = vmatpush3.bf16.msra.mxu0 %v1174_v25 }
  0x30   : > { %1134 = vmatprep.subr.bf16.mxu0 %v1175_v26 }
  0x33   : > { %1135 = vmatpush3.bf16.msra.mxu0 %v1175_v26 }
  0xd0   : > { %v1066_v32 = vpop.f32.mrf.mxu0 }
  0xd1   : > { %v433_v33 = vadd.f32 %v1066_v32, %v972_v31 }
  0xd2   : > { %v427_v34 = vpop.f32.mrf.mxu0 }
  0xd3   : > { %v428_v35 = vadd.f32 %v972_v31, %v427_v34  ;;  %v507_v37 = vmax.f32 %v433_v33, 0.0 }
  0xd4   : > { %v1069_v36 = vpop.f32.mrf.mxu0 }
  0xd5   : > { %v506_v38 = vmax.f32 %v428_v35, 0.0  ;;  %v443_v39 = vadd.f32 %v1069_v36, %v972_v31 }
  0xd6   : > { %v437_v40 = vpop.f32.mrf.mxu0 }
  0xd7   : > { %v438_v41 = vadd.f32 %v972_v31, %v437_v40  ;;  %v522_v42 = vpack.c.bf16 %v507_v37, %v506_v38  ;;  %v509_v44 = vmax.f32 %v443_v39, 0.0 }
  0xd8   : > { %v1072_v43 = vpop.f32.mrf.mxu0 }
  0xd9   : > { %v508_v45 = vmax.f32 %v438_v41, 0.0  ;;  %v453_v46 = vadd.f32 %v1072_v43, %v972_v31  ;;  %1104 = vmatprep.mubr.bf16.mxu1 %v522_v42 }
  0xda   : > { %v447_v47 = vpop.f32.mrf.mxu0 }
  0xdb   : > { %v523_v48 = vpack.c.bf16 %v509_v44, %v508_v45  ;;  %v448_v49 = vadd.f32 %v972_v31, %v447_v47  ;;  %v511_v51 = vmax.f32 %v453_v46, 0.0 }
  0xdc   : > { %v1075_v50 = vpop.f32.mrf.mxu0 }
  0xdd   : > { %v510_v52 = vmax.f32 %v448_v49, 0.0  ;;  %v463_v53 = vadd.f32 %v1075_v50, %v972_v31  ;;  %1105 = vmatmul.mubr.bf16.vlgmr.msra.gmra.mxu1 %v523_v48 }
  0xde   : > { %v457_v54 = vpop.f32.mrf.mxu0 }
  0xdf   : > { %v524_v55 = vpack.c.bf16 %v511_v51, %v510_v52  ;;  %v458_v56 = vadd.f32 %v972_v31, %v457_v54  ;;  %v513_v58 = vmax.f32 %v463_v53, 0.0 }
  0xe0   : > { %v1078_v57 = vpop.f32.mrf.mxu0 }
  0xe1   : > { %v512_v59 = vmax.f32 %v458_v56, 0.0  ;;  %v473_v60 = vadd.f32 %v1078_v57, %v972_v31  ;;  %1108 = vmatprep.mubr.bf16.mxu1 %v524_v55 }
  0xe2   : > { %v467_v61 = vpop.f32.mrf.mxu0 }
  0xe3   : > { %v525_v62 = vpack.c.bf16 %v513_v58, %v512_v59  ;;  %v468_v63 = vadd.f32 %v972_v31, %v467_v61  ;;  %v515_v1 = vmax.f32 %v473_v60, 0.0 }
  0xe4   : > { %v1081_v0 = vpop.f32.mrf.mxu0 }
  0xe5   : > { %v514_v2 = vmax.f32 %v468_v63, 0.0  ;;  %v483_v3 = vadd.f32 %v1081_v0, %v972_v31  ;;  %1109 = vmatmul.mubr.bf16.gmra.mxu1 %v525_v62 }
  0xe6   : > { %v477_v4 = vpop.f32.mrf.mxu0 }
  0xe7   : > { %v526_v5 = vpack.c.bf16 %v515_v1, %v514_v2  ;;  %v478_v6 = vadd.f32 %v972_v31, %v477_v4  ;;  %v517_v8 = vmax.f32 %v483_v3, 0.0 }
  0xe8   : > { %v1084_v7 = vpop.f32.mrf.mxu0 }
  0xe9   : > { %v516_v9 = vmax.f32 %v478_v6, 0.0  ;;  %v493_v10 = vadd.f32 %v1084_v7, %v972_v31  ;;  %1112 = vmatprep.mubr.bf16.mxu1 %v526_v5 }
  0xea   : > { %v487_v11 = vpop.f32.mrf.mxu0 }
  0xeb   : > { %v527_v12 = vpack.c.bf16 %v517_v8, %v516_v9  ;;  %v488_v13 = vadd.f32 %v972_v31, %v487_v11  ;;  %v519_v15 = vmax.f32 %v493_v10, 0.0 }
  0xec   : > { %v1087_v14 = vpop.f32.mrf.mxu0 }
  0xed   : > { %v518_v16 = vmax.f32 %v488_v13, 0.0  ;;  %v503_v17 = vadd.f32 %v1087_v14, %v972_v31  ;;  %1113 = vmatmul.mubr.bf16.gmra.mxu1 %v527_v12 }
  0xee   : > { %v497_v18 = vpop.f32.mrf.mxu0 }
  0xef   : > { %v528_v19 = vpack.c.bf16 %v519_v15, %v518_v16  ;;  %v498_v20 = vadd.f32 %v972_v31, %v497_v18  ;;  %v521_v21 = vmax.f32 %v503_v17, 0.0 }
  0xf1   : > { %v520_v22 = vmax.f32 %v498_v20, 0.0  ;;  %1116 = vmatprep.mubr.bf16.mxu1 %v528_v19  ;;  %v999_v20 = vld [vmem:[%s1385_s6] ss:$0 sm:$0xff] }
  0xf3   : > { %v529_v23 = vpack.c.bf16 %v521_v21, %v520_v22 }
  0xf5   : > { %1117 = vmatmul.mubr.bf16.gmra.mxu1 %v529_v23 }
 0x19d   : > { %v1106_v27 = vpop.f32.mrf.mxu1 }
 0x19e   : > { %v644_v33 = vadd.f32 %v1106_v27, %v990_v29 }
 0x19f   : > { %v635_v28 = vpop.f32.mrf.mxu1 }
 0x1a0   : > { %v636_v31 = vadd.f32 %v990_v29, %v635_v28  ;;  %v700_v40 = vmax.f32 %v644_v33, 0.0 }
 0x1a1   : > { %v1107_v30 = vpop.f32.mrf.mxu1 }
 0x1a2   : > { %v647_v32 = vadd.f32 %v1107_v30, %v990_v29  ;;  %v698_v38 = vmax.f32 %v636_v31, 0.0 }
 0x1a3   : > { %v638_v34 = vpop.f32.mrf.mxu1 }
 0x1a4   : > { %v639_v35 = vadd.f32 %v990_v29, %v638_v34  ;;  %v701_v36 = vmax.f32 %v647_v32, 0.0 }
 0x1a5   : > { %v1110_v37 = vpop.f32.mrf.mxu1 }
 0x1a6   : > { %v699_v39 = vmax.f32 %v639_v35, 0.0  ;;  %v715_v43 = vpack.c.bf16 %v701_v36, %v700_v40  ;;  %v660_v47 = vadd.f32 %v1110_v37, %v990_v29 }
 0x1a7   : > { %v651_v41 = vpop.f32.mrf.mxu1 }
 0x1a8   : > { %v714_v42 = vpack.c.bf16 %v699_v39, %v698_v38  ;;  %v652_v45 = vadd.f32 %v990_v29, %v651_v41  ;;  %v704_v54 = vmax.f32 %v660_v47, 0.0 }
 0x1a9   : > { %v1111_v44 = vpop.f32.mrf.mxu1 }
 0x1aa   : > { %v663_v46 = vadd.f32 %v1111_v44, %v990_v29  ;;  %1136 = vmatprep.mubr.bf16.mxu0 %v714_v42  ;;  %v702_v52 = vmax.f32 %v652_v45, 0.0 }
 0x1ab   : > { %v654_v48 = vpop.f32.mrf.mxu1  ;;  %1137 = vmatmul.mubr.bf16.vlgmr.msra.gmra.mxu0 %v715_v43 }
 0x1ac   : > { %v655_v49 = vadd.f32 %v990_v29, %v654_v48  ;;  %v705_v50 = vmax.f32 %v663_v46, 0.0 }
 0x1ad   : > { %v1114_v51 = vpop.f32.mrf.mxu1 }
 0x1ae   : > { %v703_v53 = vmax.f32 %v655_v49, 0.0  ;;  %v717_v57 = vpack.c.bf16 %v705_v50, %v704_v54  ;;  %v676_v61 = vadd.f32 %v1114_v51, %v990_v29 }
 0x1af   : > { %v667_v55 = vpop.f32.mrf.mxu1 }
 0x1b0   : > { %v716_v56 = vpack.c.bf16 %v703_v53, %v702_v52  ;;  %v668_v59 = vadd.f32 %v990_v29, %v667_v55  ;;  %v708_v4 = vmax.f32 %v676_v61, 0.0 }
 0x1b1   : > { %v1115_v58 = vpop.f32.mrf.mxu1 }
 0x1b2   : > { %v679_v60 = vadd.f32 %v1115_v58, %v990_v29  ;;  %1140 = vmatprep.mubr.bf16.mxu0 %v716_v56  ;;  %v706_v2 = vmax.f32 %v668_v59, 0.0 }
 0x1b3   : > { %v670_v62 = vpop.f32.mrf.mxu1  ;;  %1141 = vmatmul.mubr.bf16.gmra.mxu0 %v717_v57 }
 0x1b4   : > { %v671_v63 = vadd.f32 %v990_v29, %v670_v62  ;;  %v709_v0 = vmax.f32 %v679_v60, 0.0 }
 0x1b5   : > { %v1118_v1 = vpop.f32.mrf.mxu1 }
 0x1b6   : > { %v707_v3 = vmax.f32 %v671_v63, 0.0  ;;  %v719_v7 = vpack.c.bf16 %v709_v0, %v708_v4  ;;  %v692_v11 = vadd.f32 %v1118_v1, %v990_v29 }
 0x1b7   : > { %v683_v5 = vpop.f32.mrf.mxu1 }
 0x1b8   : > { %v718_v6 = vpack.c.bf16 %v707_v3, %v706_v2  ;;  %v684_v9 = vadd.f32 %v990_v29, %v683_v5  ;;  %v712_v17 = vmax.f32 %v692_v11, 0.0 }
 0x1b9   : > { %v1119_v8 = vpop.f32.mrf.mxu1 }
 0x1ba   : > { %v695_v10 = vadd.f32 %v1119_v8, %v990_v29  ;;  %1144 = vmatprep.mubr.bf16.mxu0 %v718_v6  ;;  %v710_v15 = vmax.f32 %v684_v9, 0.0 }
 0x1bb   : > { %v686_v12 = vpop.f32.mrf.mxu1  ;;  %1145 = vmatmul.mubr.bf16.gmra.mxu0 %v719_v7 }
 0x1bc   : > { %v687_v13 = vadd.f32 %v990_v29, %v686_v12  ;;  %v713_v14 = vmax.f32 %v695_v10, 0.0 }
 0x1be   : > { %v711_v16 = vmax.f32 %v687_v13, 0.0  ;;  %v721_v19 = vpack.c.bf16 %v713_v14, %v712_v17 }
 0x1c0   : > { %v720_v18 = vpack.c.bf16 %v711_v16, %v710_v15 }
 0x1c2   : > { %1148 = vmatprep.mubr.bf16.mxu0 %v720_v18 }
 0x1c3   : > { %1149 = vmatmul.mubr.bf16.gmra.mxu0 %v721_v19 }
 0x26b   : > { %v1138_v21 = vpop.f32.mrf.mxu0 }
 0x26c   : > { %v836_v22 = vadd.f32 %v1138_v21, %v999_v20 }
 0x26d   : > { %v827_v23 = vpop.f32.mrf.mxu0 }
 0x26e   : > { %893 = vst.msk [vmem:[%s1342_s11 + $0x10] sm:$0xff] %vm890_vm2, %v836_v22  ;;  %v828_v24 = vadd.f32 %v999_v20, %v827_v23 }
 0x26f   : > { %v1139_v25 = vpop.f32.mrf.mxu0 }
 0x270   : > { %891 = vst.msk [vmem:[%s1342_s11] sm:$0xff] %vm890_vm2, %v828_v24  ;;  %v839_v26 = vadd.f32 %v1139_v25, %v999_v20 }
 0x271   : > { %v830_v27 = vpop.f32.mrf.mxu0 }
 0x272   : > { %894 = vst.msk [vmem:[%s1342_s11 + $0x18] sm:$0xff] %vm890_vm2, %v839_v26  ;;  %v831_v28 = vadd.f32 %v999_v20, %v830_v27 }
 0x273   : > { %v1142_v29 = vpop.f32.mrf.mxu0 }
 0x274   : > { %892 = vst.msk [vmem:[%s1342_s11 + $0x8] sm:$0xff] %vm890_vm2, %v831_v28  ;;  %v852_v30 = vadd.f32 %v1142_v29, %v999_v20 }
 0x275   : > { %v843_v31 = vpop.f32.mrf.mxu0 }
 0x276   : > { %897 = vst.msk [vmem:[%s1342_s11 + $0x30] sm:$0xff] %vm890_vm2, %v852_v30  ;;  %v844_v32 = vadd.f32 %v999_v20, %v843_v31 }
 0x277   : > { %v1143_v33 = vpop.f32.mrf.mxu0 }
 0x278   : > { %895 = vst.msk [vmem:[%s1342_s11 + $0x20] sm:$0xff] %vm890_vm2, %v844_v32  ;;  %v855_v34 = vadd.f32 %v1143_v33, %v999_v20 }
 0x279   : > { %v846_v35 = vpop.f32.mrf.mxu0 }
 0x27a   : > { %898 = vst.msk [vmem:[%s1342_s11 + $0x38] sm:$0xff] %vm890_vm2, %v855_v34  ;;  %v847_v36 = vadd.f32 %v999_v20, %v846_v35 }
 0x27b   : > { %v1146_v37 = vpop.f32.mrf.mxu0 }
 0x27c   : > { %896 = vst.msk [vmem:[%s1342_s11 + $0x28] sm:$0xff] %vm890_vm2, %v847_v36  ;;  %v868_v38 = vadd.f32 %v1146_v37, %v999_v20 }
 0x27d   : > { %v859_v39 = vpop.f32.mrf.mxu0 }
 0x27e   : > { %901 = vst.msk [vmem:[%s1342_s11 + $0x50] sm:$0xff] %vm890_vm2, %v868_v38  ;;  %v860_v40 = vadd.f32 %v999_v20, %v859_v39 }
 0x27f   : > { %v1147_v41 = vpop.f32.mrf.mxu0 }
 0x280   : > { %899 = vst.msk [vmem:[%s1342_s11 + $0x40] sm:$0xff] %vm890_vm2, %v860_v40  ;;  %v871_v42 = vadd.f32 %v1147_v41, %v999_v20 }
 0x281   : > { %v862_v43 = vpop.f32.mrf.mxu0 }
 0x282   : > { %902 = vst.msk [vmem:[%s1342_s11 + $0x58] sm:$0xff] %vm890_vm2, %v871_v42  ;;  %v863_v44 = vadd.f32 %v999_v20, %v862_v43 }
 0x283   : > { %v1150_v45 = vpop.f32.mrf.mxu0 }
 0x284   : > { %900 = vst.msk [vmem:[%s1342_s11 + $0x48] sm:$0xff] %vm890_vm2, %v863_v44  ;;  %v884_v46 = vadd.f32 %v1150_v45, %v999_v20 }
 0x285   : > { %v875_v47 = vpop.f32.mrf.mxu0 }
 0x286   : > { %905 = vst.msk [vmem:[%s1342_s11 + $0x70] sm:$0xff] %vm890_vm2, %v884_v46  ;;  %v876_v48 = vadd.f32 %v999_v20, %v875_v47 }
 0x287   : > { %v1151_v49 = vpop.f32.mrf.mxu0 }
 0x288   : > { %903 = vst.msk [vmem:[%s1342_s11 + $0x60] sm:$0xff] %vm890_vm2, %v876_v48  ;;  %v887_v50 = vadd.f32 %v1151_v49, %v999_v20 }
 0x289   : > { %v878_v51 = vpop.f32.mrf.mxu0 }
 0x28a   : > { %906 = vst.msk [vmem:[%s1342_s11 + $0x78] sm:$0xff] %vm890_vm2, %v887_v50  ;;  %v879_v52 = vadd.f32 %v999_v20, %v878_v51 }
 0x28c   : > { %904 = vst.msk [vmem:[%s1342_s11 + $0x68] sm:$0xff] %vm890_vm2, %v879_v52 }
 0x28d PF: > { %s17_s24 = sadd.s32 1, %s1182_s24  }
 0x28e   : > { %p14_p4 = scmp.ge.s32.totalorder %s17_s24, 6  }
 0x290   :  { %16 = sbr.rel (!%p14_p4) target bundleno = 1 (0x1), region = 78 }

</bundles_post_ra>
